<compile_context>
chip_gen: v7x
topology: tpu7x:2x2x1
jax: 0.10.0
libtpu: 0.0.40
codegen_flags: <defaults>
</compile_context>

<pallas_src>
import functools

import jax
import jax.numpy as jnp
from jax.experimental import pallas as pl
from jax.experimental.pallas import tpu as pltpu


def _mlp_kernel(x_ref, w1t_ref, b1_ref, w2t_ref, b2_ref, w3t_ref, b3_ref, o_ref,
                *, sigmoid: bool, acts_dtype):
    """Fused 3-layer MLP on one batch tile (transposed, lane-dense chain).

    x_ref:   (bt, D)                         -- batch tile as stored in HBM
    w1t:     (H0, D)    b1: (H0, 1)
    w2t:     (H1, H0)   b2: (H1, 1)
    w3t:     (1,  H1)   b3: (1, 1)
    o_ref:   (1, 1, bt)                      -- batch on the lane axis (lane-dense store)
    """
    # Single XLU transpose per tile; all downstream intermediates are lane-dense.
    xt = x_ref[...].T                              # (D, bt) f32
    xt = xt.astype(acts_dtype)                     # bf16 MXU operands (f32 accumulate)

    h = jnp.dot(w1t_ref[...], xt,
                preferred_element_type=jnp.float32) + b1_ref[...]     # (H0, bt)
    h = jnp.maximum(h, 0.0)                        # ReLU (f32 VPU)
    h = h.astype(acts_dtype)

    h = jnp.dot(w2t_ref[...], h,
                preferred_element_type=jnp.float32) + b2_ref[...]     # (H1, bt)
    h = jnp.maximum(h, 0.0)                        # ReLU
    h = h.astype(acts_dtype)

    logits = jnp.dot(w3t_ref[...], h,
                     preferred_element_type=jnp.float32) + b3_ref[...]  # (1, bt)

    if sigmoid:
        logits = jax.nn.sigmoid(logits)

    o_ref[...] = logits[None].astype(o_ref.dtype)  # (1, 1, bt), lane-dense store


def fully_connected_layer(x, params, *, sigmoid=True, batch_tile=4096, use_bf16=True):
    """Run the fused MLP Pallas kernel.

    x:      (B, input_size) float32
    params: dict with w1 (D, H0), b1 (1, H0), w2 (H0, H1), b2 (1, H1),
                      w3 (H1, 1),  b3 (1, 1)   (PyTorch-style weights, already (in, out))
    """
    B, D = x.shape
    w1, b1 = params["w1"], params["b1"]
    w2, b2 = params["w2"], params["b2"]
    w3, b3 = params["w3"], params["b3"]
    H0 = w1.shape[1]
    H1 = w2.shape[1]
    H2 = w3.shape[1]
    assert H2 == 1, "final layer of DIN head has a single logit"

    # --- tile selection -------------------------------------------------------
    # Round requested tile to an MXU/lane-friendly multiple of 256.
    batch_tile = max(256, ((batch_tile + 255) // 256) * 256)
    # Don't allocate a tile far larger than the batch, and keep >= 2 grid steps
    # whenever possible so both of v7x's TensorCores get work on the "parallel" axis.
    half = max(256, ((pl.cdiv(B, 2) + 255) // 256) * 256)
    bt = min(batch_tile, half)
    num_tiles = pl.cdiv(B, bt)   # ragged last block handled by Pallas (no jnp.pad)

    # --- parameter prep (trace-time, tiny) -----------------------------------
    acts_dtype = jnp.bfloat16 if use_bf16 else x.dtype
    w1t = w1.T.astype(acts_dtype)            # (H0, D)
    w2t = w2.T.astype(acts_dtype)            # (H1, H0)
    w3t = w3.T.astype(acts_dtype)            # (1,  H1)
    b1c = b1.reshape(H0, 1).astype(jnp.float32)
    b2c = b2.reshape(H1, 1).astype(jnp.float32)
    b3c = b3.reshape(1, 1).astype(jnp.float32)

    kernel = functools.partial(_mlp_kernel, sigmoid=sigmoid, acts_dtype=acts_dtype)

    # Advisory cost estimate so XLA can overlap surrounding work.
    flops = 2 * B * (D * H0 + H0 * H1 + H1 * H2)
    bytes_accessed = (B * D * x.dtype.itemsize + B * 4
                      + (D * H0 + H0 * H1 + H1 * H2) * jnp.dtype(acts_dtype).itemsize
                      + (H0 + H1 + H2) * 4)
    cost = pl.CostEstimate(flops=flops,
                           transcendentals=B if sigmoid else 0,
                           bytes_accessed=bytes_accessed)

    out = pl.pallas_call(
        kernel,
        out_shape=jax.ShapeDtypeStruct((num_tiles, 1, bt), x.dtype),
        grid_spec=pltpu.PrefetchScalarGridSpec(
            num_scalar_prefetch=0,
            grid=(num_tiles,),
            in_specs=[
                pl.BlockSpec((bt, D), lambda i: (i, 0)),    # x tile (pipelined; ragged tail ok)
                pl.BlockSpec((H0, D), lambda i: (0, 0)),    # w1^T (resident)
                pl.BlockSpec((H0, 1), lambda i: (0, 0)),    # b1
                pl.BlockSpec((H1, H0), lambda i: (0, 0)),   # w2^T
                pl.BlockSpec((H1, 1), lambda i: (0, 0)),    # b2
                pl.BlockSpec((1, H1), lambda i: (0, 0)),    # w3^T
                pl.BlockSpec((1, 1), lambda i: (0, 0)),     # b3
            ],
            out_specs=pl.BlockSpec((1, 1, bt), lambda i: (i, 0, 0)),
        ),
        compiler_params=pltpu.CompilerParams(
            dimension_semantics=("parallel",),
            # Raise v5e's 16 MiB default scoped limit; matches v6e/v7x defaults.
            vmem_limit_bytes=32 * 1024 * 1024,
        ),
        cost_estimate=cost,
    )(x, w1t, b1c, w2t, b2c, w3t, b3c)

    # (num_tiles, 1, bt) -> (num_tiles*bt, 1); garbage tail rows (ragged block) sliced off.
    return out.reshape(num_tiles * bt, 1)[:B]


def init_params(key, input_size, hidden_unit):
    """Deterministic init mimicking PyTorch nn.Linear default (uniform +-1/sqrt(fan_in)).
    Weights are stored transposed vs. torch: (in_features, out_features)."""
    params = {}
    dims = [input_size] + list(hidden_unit)
    for idx in range(len(hidden_unit)):
        fan_in, fan_out = dims[idx], dims[idx + 1]
        key, kw, kb = jax.random.split(key, 3)
        bound = 1.0 / jnp.sqrt(fan_in)
        params[f"w{idx + 1}"] = jax.random.uniform(
            kw, (fan_in, fan_out), jnp.float32, -bound, bound)
        params[f"b{idx + 1}"] = jax.random.uniform(
            kb, (1, fan_out), jnp.float32, -bound, bound)
    return params


def reference_forward(x, params, sigmoid=True):
    h = jnp.maximum(x @ params["w1"] + params["b1"], 0.0)
    h = jnp.maximum(h @ params["w2"] + params["b2"], 0.0)
    h = h @ params["w3"] + params["b3"]
    return jax.nn.sigmoid(h) if sigmoid else h


if __name__ == "__main__":
    input_size = 32
    hidden_unit = [64, 32, 1]
    batch = 200   # not a multiple of the tile: exercises the ragged-last-block path

    key = jax.random.PRNGKey(0)
    key, kx = jax.random.split(key)
    x = jax.random.normal(kx, (batch, input_size), jnp.float32)
    params = init_params(key, input_size, hidden_unit)

    ref = reference_forward(x, params, sigmoid=True)

    # f32 MXU-operand path (bit-for-bit-ish vs. reference)
    out_f32 = jax.block_until_ready(
        fully_connected_layer(x, params, sigmoid=True, use_bf16=False))
    assert out_f32.shape == (batch, hidden_unit[-1])
    assert jnp.allclose(out_f32, ref, atol=1e-5, rtol=1e-5), float(
        jnp.max(jnp.abs(out_f32 - ref)))

    # bf16 MXU-operand path (default; f32 accumulation, looser tolerance)
    out_bf16 = jax.block_until_ready(
        fully_connected_layer(x, params, sigmoid=True, use_bf16=True))
    assert out_bf16.shape == (batch, hidden_unit[-1])
    assert jnp.allclose(out_bf16, ref, atol=2e-2, rtol=2e-2), float(
        jnp.max(jnp.abs(out_bf16 - ref)))

    print("KERNEL_OK")
</pallas_src>

<mosaic_0001>
module attributes {stable_mosaic.version = 11 : i64} {
  func.func @_mlp_kernel(%arg0: i32, %arg1: memref<256x32xf32, #tpu.memory_space<vmem>>, %arg2: memref<64x32xf32, #tpu.memory_space<vmem>>, %arg3: memref<64x1xf32, #tpu.memory_space<vmem>>, %arg4: memref<32x64xf32, #tpu.memory_space<vmem>>, %arg5: memref<32x1xf32, #tpu.memory_space<vmem>>, %arg6: memref<1x32xf32, #tpu.memory_space<vmem>>, %arg7: memref<1x1xf32, #tpu.memory_space<vmem>>, %arg8: memref<1x1x256xf32, #tpu.memory_space<vmem>>) attributes {dimension_semantics = [#tpu.dimension_semantics<parallel>], iteration_bounds = array<i64: 1>, scalar_prefetch = 0 : i64, scratch_operands = 0 : i64, tpu.core_type = #tpu.core_type<tc>, window_params = [{transform_indices = @transform_0, window_bounds = array<i64: 256, 32>}, {pipeline_mode = #tpu.pipeline_mode<synchronous>, transform_indices = @transform_1, window_bounds = array<i64: 64, 32>}, {pipeline_mode = #tpu.pipeline_mode<synchronous>, transform_indices = @transform_2, window_bounds = array<i64: 64, 1>}, {pipeline_mode = #tpu.pipeline_mode<synchronous>, transform_indices = @transform_3, window_bounds = array<i64: 32, 64>}, {pipeline_mode = #tpu.pipeline_mode<synchronous>, transform_indices = @transform_4, window_bounds = array<i64: 32, 1>}, {pipeline_mode = #tpu.pipeline_mode<synchronous>, transform_indices = @transform_5, window_bounds = array<i64: 1, 32>}, {pipeline_mode = #tpu.pipeline_mode<synchronous>, transform_indices = @transform_6, window_bounds = array<i64: 1, 1>}, {transform_indices = @transform_7, window_bounds = array<i64: 1, 1, 256>}]} {
    %c0 = arith.constant 0 : index
    %c0_0 = arith.constant 0 : index
    %0 = vector.load %arg1[%c0, %c0_0] : memref<256x32xf32, #tpu.memory_space<vmem>>, vector<256x32xf32>
    %1 = tpu.transpose %0, [1, 0] : vector<256x32xf32> -> vector<32x256xf32>
    %c0_1 = arith.constant 0 : index
    %c0_2 = arith.constant 0 : index
    %2 = vector.load %arg2[%c0_1, %c0_2] : memref<64x32xf32, #tpu.memory_space<vmem>>, vector<64x32xf32>
    %cst = arith.constant dense<0.000000e+00> : vector<64x256xf32>
    %3 = tpu.matmul %2, %1, %cst {dimension_numbers = #tpu.dot_dimension_numbers<[1], [0], [0], [1], [0, 0, 1, 1], [], []>} : vector<64x32xf32>, vector<32x256xf32>, vector<64x256xf32> -> vector<64x256xf32>
    %c0_3 = arith.constant 0 : index
    %c0_4 = arith.constant 0 : index
    %4 = vector.load %arg3[%c0_3, %c0_4] : memref<64x1xf32, #tpu.memory_space<vmem>>, vector<64x1xf32>
    %5 = vector.broadcast %4 : vector<64x1xf32> to vector<64x256xf32>
    %6 = arith.addf %3, %5 : vector<64x256xf32>
    %cst_5 = arith.constant 0.000000e+00 : f32
    %7 = vector.broadcast %cst_5 : f32 to vector<64x256xf32>
    %8 = arith.maximumf %6, %7 : vector<64x256xf32>
    %c0_6 = arith.constant 0 : index
    %c0_7 = arith.constant 0 : index
    %9 = vector.load %arg4[%c0_6, %c0_7] : memref<32x64xf32, #tpu.memory_space<vmem>>, vector<32x64xf32>
    %cst_8 = arith.constant dense<0.000000e+00> : vector<32x256xf32>
    %10 = tpu.matmul %9, %8, %cst_8 {dimension_numbers = #tpu.dot_dimension_numbers<[1], [0], [0], [1], [0, 0, 1, 1], [], []>} : vector<32x64xf32>, vector<64x256xf32>, vector<32x256xf32> -> vector<32x256xf32>
    %c0_9 = arith.constant 0 : index
    %c0_10 = arith.constant 0 : index
    %11 = vector.load %arg5[%c0_9, %c0_10] : memref<32x1xf32, #tpu.memory_space<vmem>>, vector<32x1xf32>
    %12 = vector.broadcast %11 : vector<32x1xf32> to vector<32x256xf32>
    %13 = arith.addf %10, %12 : vector<32x256xf32>
    %cst_11 = arith.constant 0.000000e+00 : f32
    %14 = vector.broadcast %cst_11 : f32 to vector<32x256xf32>
    %15 = arith.maximumf %13, %14 : vector<32x256xf32>
    %c0_12 = arith.constant 0 : index
    %c0_13 = arith.constant 0 : index
    %16 = vector.load %arg6[%c0_12, %c0_13] : memref<1x32xf32, #tpu.memory_space<vmem>>, vector<1x32xf32>
    %cst_14 = arith.constant dense<0.000000e+00> : vector<1x256xf32>
    %17 = tpu.matmul %16, %15, %cst_14 {dimension_numbers = #tpu.dot_dimension_numbers<[1], [0], [0], [1], [0, 0, 1, 1], [], []>} : vector<1x32xf32>, vector<32x256xf32>, vector<1x256xf32> -> vector<1x256xf32>
    %c0_15 = arith.constant 0 : index
    %c0_16 = arith.constant 0 : index
    %18 = vector.load %arg7[%c0_15, %c0_16] : memref<1x1xf32, #tpu.memory_space<vmem>>, vector<1x1xf32>
    %19 = vector.broadcast %18 : vector<1x1xf32> to vector<1x256xf32>
    %20 = arith.addf %17, %19 : vector<1x256xf32>
    %21 = arith.negf %20 : vector<1x256xf32>
    %22 = math.exp %21 : vector<1x256xf32>
    %cst_17 = arith.constant 1.000000e+00 : f32
    %23 = vector.broadcast %cst_17 : f32 to vector<1x256xf32>
    %24 = arith.addf %23, %22 : vector<1x256xf32>
    %25 = arith.divf %23, %24 : vector<1x256xf32>
    %26 = vector.shape_cast %25 : vector<1x256xf32> to vector<1x1x256xf32>
    %c0_18 = arith.constant 0 : index
    %c0_19 = arith.constant 0 : index
    %c0_20 = arith.constant 0 : index
    %27 = vector.load %arg8[%c0_18, %c0_19, %c0_20] : memref<1x1x256xf32, #tpu.memory_space<vmem>>, vector<1x1x256xf32>
    tpu.vector_store %arg8[%c0_18, %c0_19, %c0_20], %26 {strides = array<i32>} : memref<1x1x256xf32, #tpu.memory_space<vmem>>, vector<1x1x256xf32>,
    return
  }
  func.func @transform_0(%arg0: i32) -> (i32, i32) {
    %c0_i32 = arith.constant 0 : i32
    %c0_i32_0 = arith.constant 0 : i32
    return %arg0, %c0_i32 : i32, i32
  }
  func.func @transform_1(%arg0: i32) -> (i32, i32) {
    %c0_i32 = arith.constant 0 : i32
    %c0_i32_0 = arith.constant 0 : i32
    %c0_i32_1 = arith.constant 0 : i32
    return %c0_i32, %c0_i32_0 : i32, i32
  }
  func.func @transform_2(%arg0: i32) -> (i32, i32) {
    %c0_i32 = arith.constant 0 : i32
    %c0_i32_0 = arith.constant 0 : i32
    %c0_i32_1 = arith.constant 0 : i32
    return %c0_i32, %c0_i32_0 : i32, i32
  }
  func.func @transform_3(%arg0: i32) -> (i32, i32) {
    %c0_i32 = arith.constant 0 : i32
    %c0_i32_0 = arith.constant 0 : i32
    %c0_i32_1 = arith.constant 0 : i32
    return %c0_i32, %c0_i32_0 : i32, i32
  }
  func.func @transform_4(%arg0: i32) -> (i32, i32) {
    %c0_i32 = arith.constant 0 : i32
    %c0_i32_0 = arith.constant 0 : i32
    %c0_i32_1 = arith.constant 0 : i32
    return %c0_i32, %c0_i32_0 : i32, i32
  }
  func.func @transform_5(%arg0: i32) -> (i32, i32) {
    %c0_i32 = arith.constant 0 : i32
    %c0_i32_0 = arith.constant 0 : i32
    %c0_i32_1 = arith.constant 0 : i32
    return %c0_i32, %c0_i32_0 : i32, i32
  }
  func.func @transform_6(%arg0: i32) -> (i32, i32) {
    %c0_i32 = arith.constant 0 : i32
    %c0_i32_0 = arith.constant 0 : i32
    %c0_i32_1 = arith.constant 0 : i32
    return %c0_i32, %c0_i32_0 : i32, i32
  }
  func.func @transform_7(%arg0: i32) -> (i32, i32, i32) {
    %c0_i32 = arith.constant 0 : i32
    %c0_i32_0 = arith.constant 0 : i32
    %c0_i32_1 = arith.constant 0 : i32
    return %arg0, %c0_i32, %c0_i32_0 : i32, i32, i32
  }
}

</mosaic_0001>

<bundles_post_ra>
// kernel: tpu_custom_call.1
= control target key start
LH: loop header
LB: loop body
LE: loop exit
PB: predicated region body
PF: predicated region fallthrough
CT: control target
= control target key end

     0   :  { %s1138_s0 = inlined_call_operand.vmem [shape: f32[200,32], index: 0, kind: input, shape index: {}]   ;;  %s1139_s1 = inlined_call_operand.vmem [shape: f32[64,32], index: 1, kind: input, shape index: {}]   ;;  %s1140_s2 = inlined_call_operand.vmem [shape: f32[64,1], index: 2, kind: input, shape index: {}]   ;;  %s1141_s3 = inlined_call_operand.vmem [shape: f32[32,64], index: 3, kind: input, shape index: {}]   ;;  %s1142_s4 = inlined_call_operand.vmem [shape: f32[32,1], index: 4, kind: input, shape index: {}]   ;;  %s1143_s5 = inlined_call_operand.vmem [shape: f32[1,32], index: 5, kind: input, shape index: {}]   ;;  %s1144_s6 = inlined_call_operand.<no memory space> [shape: f32[1,1], index: 6, kind: input, shape index: {}]   ;;  %s1145_s7 = inlined_call_operand.hbm [shape: f32[1,1,256], index: 7, kind: output, shape index: {}]  }
   0x1   :  { %v12_v0 = vstv %s1144_s6 }
   0x2   :  { %13 = vst [vmem:[#allocation2] sm:$0x1] %v12_v0 }
   0x3   :  { %v45_v1 = vld [vmem:[%s1138_s0 + $0x80] sm:$0xff]  ;;  %v46_v2 = vld [vmem:[%s1138_s0 + $0x88] sm:$0xff]  ;;  %vm117_vm0 = vcmask 261120   ;;  %v47_v7 = vld [vmem:[%s1138_s0 + $0x90] sm:$0xff]  ;;  %v844_v8 = vmov 0  }
   0x4   :  { %v29_v3 = vld [vmem:[%s1138_s0] sm:$0xff]  ;;  %v734_v4 = vpack.c.bf16 %v46_v2, %v45_v1  ;;  %vm902_vm1 = vmpackc.low %vm117_vm0, %vm117_vm0  ;;  %v30_v6 = vld [vmem:[%s1138_s0 + $0x8] sm:$0xff]  ;;  %810 = vset.pattern.permute.xlu0 %v844_v8  ;;  %811 = vset.pattern.permute.xlu1 %v844_v8 }
   0x5   :  { %v737_v9 = vpack.c.bf16 %v30_v6, %v29_v3  ;;  %v48_v10 = vld [vmem:[%s1138_s0 + $0x98] sm:$0xff]  ;;  %v31_v12 = vld [vmem:[%s1138_s0 + $0x10] sm:$0xff]  ;;  %v49_v14 = vld [vmem:[%s1138_s0 + $0xa0] sm:$0xff] }
   0x6   :  { %736 = vmatprep.subr.msk.bf16.mxu0 %vm902_vm1, %v734_v4  ;;  %v740_v11 = vpack.c.bf16 %v48_v10, %v47_v7  ;;  %v32_v13 = vld [vmem:[%s1138_s0 + $0x18] sm:$0xff]  ;;  %v50_v15 = vld [vmem:[%s1138_s0 + $0xa8] sm:$0xff]  ;;  %v936_v18 = vld [vmem:[%s1139_s1] sm:$0xff] }
   0x7   :  { %739 = vmatpush3.bf16.xpose.msk.msra.mxu0 %vm902_vm1, %v737_v9  ;;  %v743_v16 = vpack.c.bf16 %v32_v13, %v31_v12  ;;  %v746_v17 = vpack.c.bf16 %v50_v15, %v49_v14  ;;  %718 = vmatprep.mubr.msk.f32.mxu0 %vm117_vm0, %v936_v18  ;;  %v33_v19 = vld [vmem:[%s1138_s0 + $0x20] sm:$0xff]  ;;  %v34_v20 = vld [vmem:[%s1138_s0 + $0x28] sm:$0xff]  ;;  %v51_v22 = vld [vmem:[%s1138_s0 + $0xb0] sm:$0xff] }
   0x8   :  { %742 = vmatprep.subr.msk.bf16.mxu0 %vm902_vm1, %v740_v11  ;;  %v69_v21 = vld [vmem:[%s1140_s2] sm:$0xff]  ;;  %v52_v23 = vld [vmem:[%s1138_s0 + $0xb8] sm:$0xff]  ;;  %v71_v24 = vld [vmem:[%s1140_s2 + $0x10] sm:$0xff]  ;;  %v749_v26 = vpack.c.bf16 %v34_v20, %v33_v19 }
   0x9   :  { %79 = vperm.xlu0 %810, %v69_v21   ;;  %v70_v25 = vld [vmem:[%s1140_s2 + $0x8] sm:$0xff]  ;;  %89 = vperm.xlu1 %811, %v71_v24   ;;  %v72_v27 = vld [vmem:[%s1140_s2 + $0x18] sm:$0xff]  ;;  %v752_v28 = vpack.c.bf16 %v52_v23, %v51_v22 }
   0xd   :  { %84 = vperm.xlu0 %810, %v70_v25  }
   0xf   :  { %745 = vmatpush3.bf16.xpose.msk.msra.mxu0 %vm902_vm1, %v743_v16 }
  0x10   :  { %748 = vmatprep.subr.msk.bf16.mxu0 %vm902_vm1, %v746_v17 }
  0x11   :  { %14 = vsyncpa [#allocation4], 0  ;;  %v73_v29 = vld [vmem:[%s1140_s2 + $0x20] sm:$0xff]  ;;  %94 = vperm.xlu1 %811, %v72_v27   ;;  %v74_v30 = vld [vmem:[%s1140_s2 + $0x28] sm:$0xff]  ;;  %v845_v8 = vmov 0.0   ;;  %vm395_vm2 = vcmask 523264  }
  0x12   :  { %v35_v31 = vld [vmem:[%s1138_s0 + $0x30] sm:$0xff]  ;;  %v36_v32 = vld [vmem:[%s1138_s0 + $0x38] sm:$0xff]  ;;  %v53_v33 = vld [vmem:[%s1138_s0 + $0xc0] sm:$0xff]  ;;  %99 = vperm.xlu0 %810, %v73_v29   ;;  %472 = vmatprep.mubr.f32.mxu1 %v845_v8 }
  0x13   :  { %v54_v34 = vld [vmem:[%s1138_s0 + $0xc8] sm:$0xff]  ;;  %v75_v35 = vld [vmem:[%s1140_s2 + $0x30] sm:$0xff]  ;;  %v755_v36 = vpack.c.bf16 %v36_v32, %v35_v31  ;;  %v76_v37 = vld [vmem:[%s1140_s2 + $0x38] sm:$0xff] }
  0x14   :  { %v758_v38 = vpack.c.bf16 %v54_v34, %v53_v33  ;;  %v371_v39 = vld [vmem:[%s1142_s4] sm:$0xff]  ;;  %v372_v40 = vld [vmem:[%s1142_s4 + $0x8] sm:$0xff]  ;;  %v55_v43 = vld [vmem:[%s1138_s0 + $0xd0] sm:$0xff] }
  0x15   :  { %104 = vperm.xlu1 %811, %v74_v30   ;;  %v37_v41 = vld [vmem:[%s1138_s0 + $0x40] sm:$0xff]  ;;  %v38_v42 = vld [vmem:[%s1138_s0 + $0x48] sm:$0xff]  ;;  %v56_v44 = vld [vmem:[%s1138_s0 + $0xd8] sm:$0xff] }
  0x16   :  { %109 = vperm.xlu0 %810, %v75_v35   ;;  %v373_v45 = vld [vmem:[%s1142_s4 + $0x10] sm:$0xff]  ;;  %v761_v46 = vpack.c.bf16 %v38_v42, %v37_v41  ;;  %v374_v47 = vld [vmem:[%s1142_s4 + $0x18] sm:$0xff]  ;;  %v764_v48 = vpack.c.bf16 %v56_v44, %v55_v43  ;;  %v506_v49 = vld [vmem:[#allocation2] sm:$0x1] }
  0x17   :  { %751 = vmatpush3.bf16.xpose.msk.msra.mxu0 %vm902_vm1, %v749_v26  ;;  %v39_v50 = vld [vmem:[%s1138_s0 + $0x50] sm:$0xff]  ;;  %v40_v51 = vld [vmem:[%s1138_s0 + $0x58] sm:$0xff]  ;;  %v57_v52 = vld [vmem:[%s1138_s0 + $0xe0] sm:$0xff] }
  0x18   :  { %754 = vmatprep.subr.msk.bf16.mxu0 %vm902_vm1, %v752_v28  ;;  %v58_v53 = vld [vmem:[%s1138_s0 + $0xe8] sm:$0xff]  ;;  %v767_v54 = vpack.c.bf16 %v40_v51, %v39_v50  ;;  %v41_v56 = vld [vmem:[%s1138_s0 + $0x60] sm:$0xff]  ;;  %v59_v58 = vld [vmem:[%s1138_s0 + $0xf0] sm:$0xff] }
  0x19   :  { %114 = vperm.xlu1 %811, %v76_v37   ;;  %v770_v55 = vpack.c.bf16 %v58_v53, %v57_v52  ;;  %v42_v57 = vld [vmem:[%s1138_s0 + $0x68] sm:$0xff]  ;;  %v60_v59 = vld [vmem:[%s1138_s0 + $0xf8] sm:$0xff]  ;;  %v43_v62 = vld [vmem:[%s1138_s0 + $0x70] sm:$0xff] }
  0x1a   :  { %377 = vperm.xlu0 %810, %v371_v39   ;;  %v773_v60 = vpack.c.bf16 %v42_v57, %v41_v56  ;;  %v776_v61 = vpack.c.bf16 %v60_v59, %v59_v58  ;;  %v44_v63 = vld [vmem:[%s1138_s0 + $0x78] sm:$0xff]  ;;  %v62_v1 = vld [vmem:[%s1139_s1 + $0x8] sm:$0xff]  ;;  %v63_v2 = vld [vmem:[%s1139_s1 + $0x10] sm:$0xff] }
  0x1b   :  { %v779_v0 = vpack.c.bf16 %v44_v63, %v43_v62  ;;  %v64_v3 = vld [vmem:[%s1139_s1 + $0x18] sm:$0xff]  ;;  %v65_v4 = vld [vmem:[%s1139_s1 + $0x20] sm:$0xff]  ;;  %v66_v5 = vld [vmem:[%s1139_s1 + $0x28] sm:$0xff] }
  0x1c   :  { %v67_v6 = vld [vmem:[%s1139_s1 + $0x30] sm:$0xff]  ;;  %v68_v7 = vld [vmem:[%s1139_s1 + $0x38] sm:$0xff] }
  0x1d   :  { %382 = vperm.xlu1 %811, %v372_v40  }
  0x1e   :  { %387 = vperm.xlu0 %810, %v373_v45  }
  0x1f   :  { %757 = vmatpush3.bf16.xpose.msk.msra.mxu0 %vm902_vm1, %v755_v36 }
  0x20   :  { %760 = vmatprep.subr.msk.bf16.mxu0 %vm902_vm1, %v758_v38 }
  0x21   :  { %392 = vperm.xlu1 %811, %v374_v47  }
  0x22   :  { %509 = vperm.xlu0 %810, %v506_v49  }
  0x27   :  { %763 = vmatpush3.bf16.xpose.msk.msra.mxu0 %vm902_vm1, %v761_v46 }
  0x28   :  { %766 = vmatprep.subr.msk.bf16.mxu0 %vm902_vm1, %v764_v48 }
  0x2f   :  { %769 = vmatpush3.bf16.xpose.msk.msra.mxu0 %vm902_vm1, %v767_v54 }
  0x30   :  { %772 = vmatprep.subr.msk.bf16.mxu0 %vm902_vm1, %v770_v55 }
  0x37   :  { %775 = vmatpush3.bf16.xpose.msk.msra.mxu0 %vm902_vm1, %v773_v60 }
  0x38   :  { %778 = vmatprep.subr.msk.bf16.mxu0 %vm902_vm1, %v776_v61 }
  0x3f   :  { %781 = vmatpush3.bf16.xpose.msk.msra.mxu0 %vm902_vm1, %v779_v0 }
  0x46   :  { %719 = vmatmul.mubr.msk.f32.vlgmr.msra.gmra.mrb[0].mxu0 %vm117_vm0, %v936_v18 }
  0x47   :  { %720 = vmatprep.mubr.msk.f32.mxu0 %vm117_vm0, %v62_v1 }
  0x4a   :  { %721 = vmatmul.mubr.msk.f32.gmra.mrb[2].mxu0 %vm117_vm0, %v62_v1 }
  0x4b   :  { %722 = vmatprep.mubr.msk.f32.mxu0 %vm117_vm0, %v63_v2 }
  0x4e   :  { %723 = vmatmul.mubr.msk.f32.gmra.mrb[4].mxu0 %vm117_vm0, %v63_v2 }
  0x4f   :  { %724 = vmatprep.mubr.msk.f32.mxu0 %vm117_vm0, %v64_v3 }
  0x52   :  { %725 = vmatmul.mubr.msk.f32.gmra.mrb[6].mxu0 %vm117_vm0, %v64_v3 }
  0x53   :  { %726 = vmatprep.mubr.msk.f32.mxu0 %vm117_vm0, %v65_v4 }
  0x56   :  { %727 = vmatmul.mubr.msk.f32.gmra.mrb[8].mxu0 %vm117_vm0, %v65_v4 }
  0x57   :  { %728 = vmatprep.mubr.msk.f32.mxu0 %vm117_vm0, %v66_v5 }
  0x5a   :  { %729 = vmatmul.mubr.msk.f32.gmra.mrb[10].mxu0 %vm117_vm0, %v66_v5 }
  0x5b   :  { %730 = vmatprep.mubr.msk.f32.mxu0 %vm117_vm0, %v67_v6 }
  0x5e   :  { %731 = vmatmul.mubr.msk.f32.gmra.mrb[12].mxu0 %vm117_vm0, %v67_v6 }
  0x5f   :  { %732 = vmatprep.mubr.msk.f32.mxu0 %vm117_vm0, %v68_v7 }
  0x62   :  { %733 = vmatmul.mubr.msk.f32.gmra.mrb[14].mxu0 %vm117_vm0, %v68_v7 }
  0x88   :  { %v80_v9 = vpop.permute.xlu0 %79  ;;  %v90_v18 = vpop.permute.xlu1 %89 }
  0x8c   :  { %v85_v13 = vpop.permute.xlu0 %84 }
  0x90   :  { %v95_v29 = vpop.permute.xlu1 %94 }
  0x91   :  { %v100_v42 = vpop.permute.xlu0 %99 }
  0x94   :  { %v105_v45 = vpop.permute.xlu1 %104 }
  0x95   :  { %v110_v58 = vpop.permute.xlu0 %109 }
  0x98   :  { %v115_v61 = vpop.permute.xlu1 %114 }
 0x119   :  { %v304_v10 = vpop.f32.mrb[0].mxu0 }
 0x11a   :  { %v306_v11 = vpop.f32.mrb[1].mxu0  ;;  %v305_v12 = vadd.f32 %v304_v10, %v80_v9  ;;  %v367_v10 = vld [vmem:[%s1141_s3] sm:$0xff] }
 0x11b   :  { %v307_v14 = vadd.f32 %v306_v11, %v80_v9  ;;  %v368_v11 = vld [vmem:[%s1141_s3 + $0x8] sm:$0xff] }
 0x11c   :  { %v351_v20 = vmax.f32 %v305_v12, 0.0  ;;  %v369_v12 = vld [vmem:[%s1141_s3 + $0x10] sm:$0xff] }
 0x11d   :  { %v310_v15 = vpop.f32.mrb[2].mxu0  ;;  %v352_v22 = vmax.f32 %v307_v14, 0.0 }
 0x11e   :  { %v311_v16 = vadd.f32 %v310_v15, %v85_v13  ;;  %v312_v17 = vpop.f32.mrb[3].mxu0 }
 0x11f   :  { %v313_v19 = vadd.f32 %v312_v17, %v85_v13  ;;  %v370_v13 = vld [vmem:[%s1141_s3 + $0x18] sm:$0xff] }
 0x120   :  { %v353_v21 = vmax.f32 %v311_v16, 0.0  ;;  %v378_v16 = vpop.permute.xlu0 %377 }
 0x121   :  { %v354_v23 = vmax.f32 %v313_v19, 0.0  ;;  %v316_v24 = vpop.f32.mrb[4].mxu0 }
 0x122   :  { %v318_v25 = vpop.f32.mrb[5].mxu0  ;;  %v784_v26 = vpack.c.bf16 %v353_v21, %v351_v20  ;;  %v317_v28 = vadd.f32 %v316_v24, %v90_v18 }
 0x123   :  { %v782_v27 = vpack.c.bf16 %v354_v23, %v352_v22  ;;  %v319_v30 = vadd.f32 %v318_v25, %v90_v18  ;;  %v383_v18 = vpop.permute.xlu1 %382 }
 0x124   :  { %v355_v35 = vmax.f32 %v317_v28, 0.0 }
 0x125   :  { %v322_v31 = vpop.f32.mrb[6].mxu0  ;;  %783 = vmatprep.subr.bf16.mxu1 %v782_v27  ;;  %v356_v37 = vmax.f32 %v319_v30, 0.0 }
 0x126   :  { %v323_v32 = vadd.f32 %v322_v31, %v95_v29  ;;  %v324_v33 = vpop.f32.mrb[7].mxu0  ;;  %785 = vmatpush1.bf16.msra.mxu1 %v784_v26  ;;  %v388_v31 = vpop.permute.xlu0 %387 }
 0x127   :  { %v325_v34 = vadd.f32 %v324_v33, %v95_v29  ;;  %v393_v33 = vpop.permute.xlu1 %392 }
 0x128   :  { %v357_v36 = vmax.f32 %v323_v32, 0.0 }
 0x129   :  { %v358_v38 = vmax.f32 %v325_v34, 0.0  ;;  %v328_v39 = vpop.f32.mrb[8].mxu0 }
 0x12a   :  { %v788_v40 = vpack.c.bf16 %v357_v36, %v355_v35  ;;  %v330_v41 = vpop.f32.mrb[9].mxu0  ;;  %v329_v44 = vadd.f32 %v328_v39, %v100_v42 }
 0x12b   :  { %v786_v43 = vpack.c.bf16 %v358_v38, %v356_v37  ;;  %v331_v46 = vadd.f32 %v330_v41, %v100_v42 }
 0x12c   :  { %v359_v51 = vmax.f32 %v329_v44, 0.0 }
 0x12d   :  { %v334_v47 = vpop.f32.mrb[10].mxu0  ;;  %787 = vmatprep.subr.bf16.mxu1 %v786_v43  ;;  %v360_v53 = vmax.f32 %v331_v46, 0.0  ;;  %v512_v46 = vlaneseq }
 0x12e   :  { %v335_v48 = vadd.f32 %v334_v47, %v105_v45  ;;  %v336_v49 = vpop.f32.mrb[11].mxu0  ;;  %789 = vmatpush1.bf16.msra.mxu1 %v788_v40 }
 0x12f   :  { %v337_v50 = vadd.f32 %v336_v49, %v105_v45  ;;  %v505_v45 = vld [vmem:[%s1143_s5] sm:$0x1]  ;;  %v513_v47 = vshrl.u32 %v512_v46, 7  ;;  %v510_v49 = vpop.permute.xlu0 %509  ;;  %s847_s5 = smov [#allocation3]   ;;  %vm622_vm3 = vcmp.lt.s32.totalorder %v512_v46, 256 }
 0x130   :  { %v361_v52 = vmax.f32 %v335_v48, 0.0  ;;  %s631_s13 = sshll.u32 %s847_s5, 4  ;;  %s632_s13 = int_to_ptr.vmem [resolvable:$true] %s631_s13 }
 0x131   :  { %v362_v54 = vmax.f32 %v337_v50, 0.0  ;;  %v340_v55 = vpop.f32.mrb[12].mxu0  ;;  %v514_v48 = vsub.s32 0, %v513_v47  ;;  %s820_s2 = scalar_lea.vmem %s632_s13, 32  ;;  %p825_p1 = scmp.lt.s32.totalorder %s632_s13, %s632_s13 }
 0x132   :  { %v792_v56 = vpack.c.bf16 %v361_v52, %v359_v51  ;;  %v342_v57 = vpop.f32.mrb[13].mxu0  ;;  %v341_v60 = vadd.f32 %v340_v55, %v110_v58  ;;  %p821_p0 = scmp.ne.s32.totalorder %s632_s13, %s820_s2  ;;  %p826_p2 = scmp.lt.s32.totalorder %s820_s2, %s820_s2 }
 0x133   :  { %v790_v59 = vpack.c.bf16 %v362_v54, %v360_v53  ;;  %v343_v62 = vadd.f32 %v342_v57, %v110_v58  ;;  %v515_v50 = vrot.slane %v510_v49, %v514_v48 }
 0x134   :  { %v363_v3 = vmax.f32 %v341_v60, 0.0  ;;  %p827_p3 = por %p826_p2, %p825_p1 }
 0x135   :  { %v346_v63 = vpop.f32.mrb[14].mxu0  ;;  %791 = vmatprep.subr.bf16.mxu1 %v790_v59  ;;  %v364_v5 = vmax.f32 %v343_v62, 0.0 }
 0x136   :  { %v347_v0 = vadd.f32 %v346_v63, %v115_v61  ;;  %v348_v1 = vpop.f32.mrb[15].mxu0  ;;  %793 = vmatpush1.bf16.msra.mxu1 %v792_v56  ;;  %p828_p4 = pnand %p827_p3, %p821_p0 }
 0x137   :  { %v349_v2 = vadd.f32 %v348_v1, %v115_v61  ;;  %v846_v61 = vmov 1966171168  }
 0x138   :  { %v365_v4 = vmax.f32 %v347_v0, 0.0  ;;  %v606_v62 = vunpack.c.l.s4 %v846_v61 }
 0x139   :  { %v366_v6 = vmax.f32 %v349_v2, 0.0 }
 0x13a   :  { %v796_v7 = vpack.c.bf16 %v365_v4, %v363_v3  ;;  %v607_v63 = vunpack.c.0.s8 %v606_v62 }
 0x13b   :  { %v794_v9 = vpack.c.bf16 %v366_v6, %v364_v5 }
 0x13c   :  { %v610_v1 = vsub.s32 %v607_v63, %v513_v47 }
 0x13d   :  { %795 = vmatprep.subr.bf16.mxu1 %v794_v9 }
 0x13e   :  { %797 = vmatpush1.bf16.msra.mxu1 %v796_v7 }
 0x141   :  { %679 = vmatmul.mubr.msk.f32.vlgmr.msra.gmra.mrb[0].mxu1 %vm395_vm2, %v367_v10 }
 0x142   :  { %478 = vmatprep.mubr.f32.mxu1 %v845_v8 }
 0x145   :  { %680 = vmatmul.mubr.msk.f32.gmra.mrb[2].mxu1 %vm395_vm2, %v368_v11 }
 0x146   :  { %484 = vmatprep.mubr.f32.mxu1 %v845_v8 }
 0x149   :  { %681 = vmatmul.mubr.msk.f32.gmra.mrb[4].mxu1 %vm395_vm2, %v369_v12 }
 0x14a   :  { %490 = vmatprep.mubr.f32.mxu1 %v845_v8 }
 0x14d   :  { %682 = vmatmul.mubr.msk.f32.gmra.mrb[6].mxu1 %vm395_vm2, %v370_v13 }
 0x14e   :  { %583 = vmatprep.mubr.f32.mxu1 %v845_v8 }
 0x214   :  { %v474_v14 = vpop.f32.mrb[0].mxu1 }
 0x215   :  { %v476_v15 = vpop.f32.mrb[1].mxu1  ;;  %v475_v17 = vadd.f32 %v474_v14, %v378_v16 }
 0x216   :  { %v477_v19 = vadd.f32 %v476_v15, %v378_v16 }
 0x217   :  { %v497_v24 = vmax.f32 %v475_v17, 0.0 }
 0x218   :  { %v480_v20 = vpop.f32.mrb[2].mxu1  ;;  %v498_v26 = vmax.f32 %v477_v19, 0.0 }
 0x219   :  { %v481_v21 = vadd.f32 %v480_v20, %v383_v18  ;;  %v482_v22 = vpop.f32.mrb[3].mxu1 }
 0x21a   :  { %v483_v23 = vadd.f32 %v482_v22, %v383_v18 }
 0x21b   :  { %v499_v25 = vmax.f32 %v481_v21, 0.0 }
 0x21c   :  { %v500_v27 = vmax.f32 %v483_v23, 0.0  ;;  %v486_v28 = vpop.f32.mrb[4].mxu1 }
 0x21d   :  { %v800_v29 = vpack.c.bf16 %v499_v25, %v497_v24  ;;  %v488_v30 = vpop.f32.mrb[5].mxu1  ;;  %v487_v8 = vadd.f32 %v486_v28, %v388_v31 }
 0x21e   :  { %v798_v32 = vpack.c.bf16 %v500_v27, %v498_v26  ;;  %v489_v34 = vadd.f32 %v488_v30, %v388_v31 }
 0x21f   :  { %v501_v39 = vmax.f32 %v487_v8, 0.0 }
 0x220   :  { %v492_v35 = vpop.f32.mrb[6].mxu1  ;;  %799 = vmatprep.subr.bf16.mxu1 %v798_v32  ;;  %v502_v41 = vmax.f32 %v489_v34, 0.0 }
 0x221   :  { %v493_v36 = vadd.f32 %v492_v35, %v393_v33  ;;  %v494_v37 = vpop.f32.mrb[7].mxu1  ;;  %801 = vmatpush1.bf16.msra.mxu1 %v800_v29 }
 0x222   :  { %v495_v38 = vadd.f32 %v494_v37, %v393_v33 }
 0x223   :  { %v503_v40 = vmax.f32 %v493_v36, 0.0 }
 0x224   :  { %v504_v42 = vmax.f32 %v495_v38, 0.0 }
 0x225   :  { %v804_v43 = vpack.c.bf16 %v503_v40, %v501_v39 }
 0x226   :  { %v802_v44 = vpack.c.bf16 %v504_v42, %v502_v41 }
 0x228   :  { %803 = vmatprep.subr.bf16.mxu1 %v802_v44 }
 0x229   :  { %805 = vmatpush1.bf16.msra.mxu1 %v804_v43 }
 0x22c   :  { %683 = vmatmul.mubr.msk.f32.vlgmr.msra.gmra.mrb[8].mxu1 %vm117_vm0, %v505_v45 }
 0x2ff   :  { %v585_v51 = vpop.f32.mrb[8].mxu1 }
 0x300   :  { %v586_v52 = vadd.f32 %v585_v51, %v515_v50  ;;  %v587_v53 = vpop.f32.mrb[9].mxu1 }
 0x301   :  { %v588_v54 = vadd.f32 %v587_v53, %v515_v50 }
 0x302   :  { %v684_v55 = vmul.f32 -1.442695, %v586_v52 }
 0x303   :  { %v685_v56 = vmul.f32 -1.442695, %v588_v54 }
 0x304   :  { %812 = vpow2.f32 %v684_v55 }
 0x305   :  { %814 = vpow2.f32 %v685_v56 }
 0x30e   :  { %v813_v57 = vpop.eup %812 }
 0x30f   :  { %v815_v58 = vpop.eup %814  ;;  %v596_v59 = vadd.f32 1.0, %v813_v57 }
 0x310   :  { %v597_v60 = vadd.f32 1.0, %v815_v58 }
 0x311   :  { %816 = vrcp.f32 %v596_v59 }
 0x312   :  { %818 = vrcp.f32 %v597_v60 }
 0x31b   :  { %v817_v0 = vpop.eup %816 }
 0x31c   :  { %v819_v2 = vpop.eup %818 }
 0x31d   :  { %v604_v3 = vcombine.low %v817_v0, %v819_v2 }
 0x31f   :  { %v611_v4 = vrot.slane %v604_v3, %v610_v1 }
 0x321   :  { %v618_v5 = vrot.slane %v611_v4, %v610_v1 }
 0x323   :  { %624 = vst.msk [vmem:[#allocation3] sm:$0x3] %vm622_vm3, %v618_v5 }
 0x324   :  { %831 = shalt.err (!%p828_p4)
}
 0x325   :  { %s832_s16 = scalar_lea.hbm %s1145_s7, 32 }
 0x326   :  { %p833_p5 = scmp.ne.s32.totalorder %s1145_s7, %s832_s16  ;;  %p836_p6 = scmp.lt.u32.totalorder %s832_s16, %s1145_s7 }
 0x328   :  { %p838_p7 = pnand %p836_p6, %p833_p5 }
 0x32a   :  { %841 = shalt.err (!%p838_p7)
}
 0x32b   :  { %634 = dma.vmem_to_hbm [thread:$0]  %s632_s13, 32, %s1145_s7, [#allocation4]  }
 0x32c   :  { %842 = dma.done.wait [#allocation4], 32  }
 0x32d   :  { %843 = vsyncadd [#allocation4], 4294967264 }
 0x32e   :  { %638 = vsyncpa [#allocation4], 1 }

</bundles_post_ra>
